<compile_context>
chip_gen: v7x
topology: tpu7x:2x2x1
jax: 0.10.0
libtpu: 0.0.40
codegen_flags: <defaults>
</compile_context>

<pallas_src>
import jax
import jax.numpy as jnp
from jax.experimental import pallas as pl
from jax.experimental.pallas import tpu as pltpu

EPS = 1e-5
ROW0 = 8   # interior of the padded scratch starts at a sublane-aligned row


def _norm_scale_shift(acc, sel, g, b, inv_n):
    """Per-channel instance-norm scale/shift from acc (H, W*C); stats in f32."""
    # Lanes -> channels reduction via MXU: (H, W*C) @ (W*C, C) -> (H, C),
    # then a sublane reduce.  var = E[x^2] - mu^2 (biased), all f32.
    ch_sum = jnp.sum(jnp.dot(acc, sel, preferred_element_type=jnp.float32),
                     axis=0, keepdims=True)                          # (1, C)
    ch_sq = jnp.sum(jnp.dot(acc * acc, sel, preferred_element_type=jnp.float32),
                    axis=0, keepdims=True)                           # (1, C)
    mu = ch_sum * inv_n
    var = ch_sq * inv_n - mu * mu
    scale = jax.lax.rsqrt(var + EPS) * g                             # EUP rsqrt
    shift = b - mu * scale
    return scale, shift


def residual_block_kernel(x_ref, w1_ref, g1_ref, b1_ref, w2_ref, g2_ref, b2_ref,
                          sel_ref, selt_ref, o_ref, pad_scr):
    # x_ref / o_ref: (1, H, W*C)         lane-dense sample (x-major, c-minor)
    # w*_ref:        (3, (W+2)*C, W*C)   banded 3x3 conv weights (one slab / ky)
    # g*/b*_ref:     (1, C)              instance-norm affine parameters
    # sel_ref:       (W*C, C)            0/1 selector: lanes -> channels
    # selt_ref:      (C, W*C)            its transpose: channels -> lanes
    # pad_scr:       (ROW0+H+1, (W+2)*C) zero-halo activation scratch (f32)
    _, H, WC = x_ref.shape
    C = sel_ref.shape[1]
    W = WC // C
    WpC = WC + 2 * C
    inv_n = 1.0 / float(H * W)
    sel = sel_ref[...]
    selt = selt_ref[...]

    def bcast(v_c):
        """(1, C) per-channel vector -> (H, W*C) in the lane layout."""
        return jnp.dot(jnp.broadcast_to(v_c, (H, C)), selt,
                       preferred_element_type=jnp.float32)

    def conv(w_ref):
        """3x3 conv as three row-shifted banded matmuls, taps read off the ref."""
        acc = jnp.dot(pad_scr[ROW0 - 1:ROW0 - 1 + H, :], w_ref[0],
                      preferred_element_type=jnp.float32)
        acc += jnp.dot(pad_scr[ROW0:ROW0 + H, :], w_ref[1],
                       preferred_element_type=jnp.float32)
        acc += jnp.dot(pad_scr[ROW0 + 1:ROW0 + 1 + H, :], w_ref[2],
                       preferred_element_type=jnp.float32)
        return acc                                                   # (H, W*C)

    # Zero only the four halo strips: the interior is fully rewritten below and
    # the halo is never written, so this is all the zero-fill a step needs.
    zrow = jnp.zeros((1, WpC), jnp.float32)
    zcol = jnp.zeros((H, C), jnp.float32)
    pad_scr[ROW0 - 1:ROW0, :] = zrow                   # top halo row
    pad_scr[ROW0 + H:ROW0 + H + 1, :] = zrow           # bottom halo row
    pad_scr[ROW0:ROW0 + H, 0:C] = zcol                 # left halo column
    pad_scr[ROW0:ROW0 + H, WC + C:WpC] = zcol          # right halo column

    # Drop the sample into the sublane-aligned interior.
    pad_scr[ROW0:ROW0 + H, C:WC + C] = x_ref[0]

    # ---- conv1 + instance-norm + ReLU --------------------------------------
    acc = conv(w1_ref)
    scale, shift = _norm_scale_shift(acc, sel, g1_ref[...], b1_ref[...], inv_n)
    y = jnp.maximum(acc * bcast(scale) + bcast(shift), 0.0)

    # Intermediate activation never leaves VMEM (halo strips are still zero).
    pad_scr[ROW0:ROW0 + H, C:WC + C] = y

    # ---- conv2 + instance-norm + residual add -------------------------------
    acc = conv(w2_ref)
    scale, shift = _norm_scale_shift(acc, sel, g2_ref[...], b2_ref[...], inv_n)
    o_ref[0] = x_ref[0] + acc * bcast(scale) + bcast(shift)


def _band_weights(w_oihw, W):
    """OIHW 3x3 weights -> (3, (W+2)*C_in, W*C_out) banded matmul operands.

    band[ky, (x+kx)*C_in + ci, x*C_out + co] = w[co, ci, ky, kx]; zero
    elsewhere, so a whole padded image row contracts against one slab per ky.
    (Small-C trick: size is (W+2)*W*C^2 per tap, fine for channel-thin convs.)
    """
    C_out, C_in, KH, KW = w_oihw.shape
    whw = jnp.transpose(w_oihw, (2, 3, 1, 0)).astype(jnp.float32)   # (ky,kx,ci,co)
    p = jnp.arange((W + 2) * C_in)
    q = jnp.arange(W * C_out)
    dx = p[:, None] // C_in - q[None, :] // C_out                   # (P, Q)
    valid = (dx >= 0) & (dx < KW)
    band = whw[:, jnp.clip(dx, 0, KW - 1),
               (p % C_in)[:, None], (q % C_out)[None, :]]           # (KH, P, Q)
    return jnp.where(valid[None], band, 0.0)


def _channel_selector(W, C):
    """0/1 matrices mapping the (x-major, c-minor) lane layout <-> channels."""
    q = jnp.arange(W * C)
    sel = (q[:, None] % C == jnp.arange(C)[None, :]).astype(jnp.float32)
    return sel, sel.T                                               # (WC,C),(C,WC)


def residual_block_lanes(x_flat, band1, g1, b1, band2, g2, b2, sel, sel_t):
    """Core pallas_call. x_flat: (B, H, W*C) f32, x-major / channel-minor lanes."""
    B, H, WC = x_flat.shape
    C = sel.shape[1]
    W = WC // C
    WpC = (W + 2) * C

    return pl.pallas_call(
        residual_block_kernel,
        out_shape=jax.ShapeDtypeStruct((B, H, WC), jnp.float32),
        grid_spec=pltpu.PrefetchScalarGridSpec(
            num_scalar_prefetch=0,
            grid=(B,),                     # B=2 -> both v7x TensorCores busy
            in_specs=[
                pl.BlockSpec((1, H, WC), lambda b: (b, 0, 0)),
                pl.BlockSpec((3, WpC, WC), lambda b: (0, 0, 0)),
                pl.BlockSpec((1, C), lambda b: (0, 0)),
                pl.BlockSpec((1, C), lambda b: (0, 0)),
                pl.BlockSpec((3, WpC, WC), lambda b: (0, 0, 0)),
                pl.BlockSpec((1, C), lambda b: (0, 0)),
                pl.BlockSpec((1, C), lambda b: (0, 0)),
                pl.BlockSpec((WC, C), lambda b: (0, 0)),
                pl.BlockSpec((C, WC), lambda b: (0, 0)),
            ],
            out_specs=pl.BlockSpec((1, H, WC), lambda b: (b, 0, 0)),
            scratch_shapes=[
                pltpu.VMEM((ROW0 + H + 1, WpC), jnp.float32),  # padded activation
            ],
        ),
        compiler_params=pltpu.CompilerParams(
            dimension_semantics=("parallel",)),
    )(x_flat, band1, g1, b1, band2, g2, b2, sel, sel_t)


@jax.jit
def residual_block(x_nchw, w1_oihw, g1, b1, w2_oihw, g2, b2):
    """PyTorch-layout entry: x NCHW, conv weights OIHW (nn.Conv2d, bias=False)."""
    B, C, H, W = x_nchw.shape
    x_flat = (jnp.transpose(x_nchw, (0, 2, 3, 1))
              .reshape(B, H, W * C).astype(jnp.float32))            # lane-dense
    band1 = _band_weights(w1_oihw, W)
    band2 = _band_weights(w2_oihw, W)
    sel, sel_t = _channel_selector(W, C)
    out = residual_block_lanes(
        x_flat, band1,
        g1.reshape(1, C).astype(jnp.float32), b1.reshape(1, C).astype(jnp.float32),
        band2,
        g2.reshape(1, C).astype(jnp.float32), b2.reshape(1, C).astype(jnp.float32),
        sel, sel_t)
    return jnp.transpose(out.reshape(B, H, W, C), (0, 3, 1, 2))


# ------------------------- pure-JAX reference ------------------------------
def _ref_forward(x, w1, g1, b1, w2, g2, b2):
    def conv(h, w):
        return jax.lax.conv_general_dilated(
            h, w, (1, 1), "SAME",
            dimension_numbers=("NCHW", "OIHW", "NCHW"))

    def inorm(h, g, b):
        mu = h.mean(axis=(2, 3), keepdims=True)
        var = ((h - mu) ** 2).mean(axis=(2, 3), keepdims=True)
        return ((h - mu) * jax.lax.rsqrt(var + EPS)
                * g[None, :, None, None] + b[None, :, None, None])

    h = jnp.maximum(inorm(conv(x, w1), g1, b1), 0.0)
    h = inorm(conv(h, w2), g2, b2)
    return x + h


if __name__ == "__main__":
    B, C, H, W = 2, 4, 16, 16  # dim_in == dim_out required by the residual add
    key = jax.random.PRNGKey(0)
    kx, kw1, kw2, kg1, kb1, kg2, kb2 = jax.random.split(key, 7)

    x = jax.random.normal(kx, (B, C, H, W), jnp.float32)
    # deterministic parameter init (Conv2d weights OIHW; InstanceNorm affine)
    w1 = jax.random.normal(kw1, (C, C, 3, 3), jnp.float32) * 0.2
    w2 = jax.random.normal(kw2, (C, C, 3, 3), jnp.float32) * 0.2
    g1 = 1.0 + 0.1 * jax.random.normal(kg1, (C,), jnp.float32)
    b1 = 0.1 * jax.random.normal(kb1, (C,), jnp.float32)
    g2 = 1.0 + 0.1 * jax.random.normal(kg2, (C,), jnp.float32)
    b2 = 0.1 * jax.random.normal(kb2, (C,), jnp.float32)

    out = jax.block_until_ready(residual_block(x, w1, g1, b1, w2, g2, b2))
    ref = jax.block_until_ready(_ref_forward(x, w1, g1, b1, w2, g2, b2))
    assert out.shape == (B, C, H, W)
    assert jnp.allclose(out, ref, rtol=1e-3, atol=1e-3), (
        float(jnp.max(jnp.abs(out - ref))))

    print("KERNEL_OK")
</pallas_src>

<mosaic_0001>
module attributes {stable_mosaic.version = 11 : i64} {
  func.func @residual_block_kernel(%arg0: i32, %arg1: memref<1x16x64xf32, #tpu.memory_space<vmem>>, %arg2: memref<3x72x64xf32, #tpu.memory_space<vmem>>, %arg3: memref<1x4xf32, #tpu.memory_space<vmem>>, %arg4: memref<1x4xf32, #tpu.memory_space<vmem>>, %arg5: memref<3x72x64xf32, #tpu.memory_space<vmem>>, %arg6: memref<1x4xf32, #tpu.memory_space<vmem>>, %arg7: memref<1x4xf32, #tpu.memory_space<vmem>>, %arg8: memref<64x4xf32, #tpu.memory_space<vmem>>, %arg9: memref<4x64xf32, #tpu.memory_space<vmem>>, %arg10: memref<1x16x64xf32, #tpu.memory_space<vmem>>, %arg11: memref<25x72xf32, #tpu.memory_space<vmem>>) attributes {dimension_semantics = [#tpu.dimension_semantics<parallel>], iteration_bounds = array<i64: 2>, scalar_prefetch = 0 : i64, scratch_operands = 1 : i64, tpu.core_type = #tpu.core_type<tc>, window_params = [{transform_indices = @transform_0, window_bounds = array<i64: 1, 16, 64>}, {pipeline_mode = #tpu.pipeline_mode<synchronous>, transform_indices = @transform_1, window_bounds = array<i64: 3, 72, 64>}, {pipeline_mode = #tpu.pipeline_mode<synchronous>, transform_indices = @transform_2, window_bounds = array<i64: 1, 4>}, {pipeline_mode = #tpu.pipeline_mode<synchronous>, transform_indices = @transform_3, window_bounds = array<i64: 1, 4>}, {pipeline_mode = #tpu.pipeline_mode<synchronous>, transform_indices = @transform_4, window_bounds = array<i64: 3, 72, 64>}, {pipeline_mode = #tpu.pipeline_mode<synchronous>, transform_indices = @transform_5, window_bounds = array<i64: 1, 4>}, {pipeline_mode = #tpu.pipeline_mode<synchronous>, transform_indices = @transform_6, window_bounds = array<i64: 1, 4>}, {pipeline_mode = #tpu.pipeline_mode<synchronous>, transform_indices = @transform_7, window_bounds = array<i64: 64, 4>}, {pipeline_mode = #tpu.pipeline_mode<synchronous>, transform_indices = @transform_8, window_bounds = array<i64: 4, 64>}, {transform_indices = @transform_9, window_bounds = array<i64: 1, 16, 64>}]} {
    %c0 = arith.constant 0 : index
    %c0_0 = arith.constant 0 : index
    %0 = vector.load %arg8[%c0, %c0_0] : memref<64x4xf32, #tpu.memory_space<vmem>>, vector<64x4xf32>
    %c0_1 = arith.constant 0 : index
    %c0_2 = arith.constant 0 : index
    %1 = vector.load %arg9[%c0_1, %c0_2] : memref<4x64xf32, #tpu.memory_space<vmem>>, vector<4x64xf32>
    %cst = arith.constant 0.000000e+00 : f32
    %2 = vector.broadcast %cst : f32 to vector<1x72xf32>
    %cst_3 = arith.constant 0.000000e+00 : f32
    %3 = vector.broadcast %cst_3 : f32 to vector<16x4xf32>
    %c7 = arith.constant 7 : index
    %c0_4 = arith.constant 0 : index
    %4 = vector.load %arg11[%c7, %c0_4] : memref<25x72xf32, #tpu.memory_space<vmem>>, vector<1x72xf32>
    tpu.vector_store %arg11[%c7, %c0_4], %2 {strides = array<i32>} : memref<25x72xf32, #tpu.memory_space<vmem>>, vector<1x72xf32>,
    %c24 = arith.constant 24 : index
    %c0_5 = arith.constant 0 : index
    %5 = vector.load %arg11[%c24, %c0_5] : memref<25x72xf32, #tpu.memory_space<vmem>>, vector<1x72xf32>
    tpu.vector_store %arg11[%c24, %c0_5], %2 {strides = array<i32>} : memref<25x72xf32, #tpu.memory_space<vmem>>, vector<1x72xf32>,
    %c8 = arith.constant 8 : index
    %c0_6 = arith.constant 0 : index
    %6 = vector.load %arg11[%c8, %c0_6] : memref<25x72xf32, #tpu.memory_space<vmem>>, vector<16x4xf32>
    tpu.vector_store %arg11[%c8, %c0_6], %3 {strides = array<i32>} : memref<25x72xf32, #tpu.memory_space<vmem>>, vector<16x4xf32>,
    %c8_7 = arith.constant 8 : index
    %c68 = arith.constant 68 : index
    %7 = vector.load %arg11[%c8_7, %c68] : memref<25x72xf32, #tpu.memory_space<vmem>>, vector<16x4xf32>
    tpu.vector_store %arg11[%c8_7, %c68], %3 {strides = array<i32>} : memref<25x72xf32, #tpu.memory_space<vmem>>, vector<16x4xf32>,
    %c0_8 = arith.constant 0 : index
    %c0_9 = arith.constant 0 : index
    %c0_10 = arith.constant 0 : index
    %8 = vector.load %arg1[%c0_8, %c0_9, %c0_10] : memref<1x16x64xf32, #tpu.memory_space<vmem>>, vector<1x16x64xf32>
    %9 = vector.shape_cast %8 : vector<1x16x64xf32> to vector<16x64xf32>
    %c8_11 = arith.constant 8 : index
    %c4 = arith.constant 4 : index
    %10 = vector.load %arg11[%c8_11, %c4] : memref<25x72xf32, #tpu.memory_space<vmem>>, vector<16x64xf32>
    tpu.vector_store %arg11[%c8_11, %c4], %9 {strides = array<i32>} : memref<25x72xf32, #tpu.memory_space<vmem>>, vector<16x64xf32>,
    %c7_12 = arith.constant 7 : index
    %c0_13 = arith.constant 0 : index
    %11 = vector.load %arg11[%c7_12, %c0_13] : memref<25x72xf32, #tpu.memory_space<vmem>>, vector<16x72xf32>
    %c0_14 = arith.constant 0 : index
    %c0_15 = arith.constant 0 : index
    %c0_16 = arith.constant 0 : index
    %12 = vector.load %arg2[%c0_14, %c0_15, %c0_16] : memref<3x72x64xf32, #tpu.memory_space<vmem>>, vector<1x72x64xf32>
    %13 = vector.shape_cast %12 : vector<1x72x64xf32> to vector<72x64xf32>
    %cst_17 = arith.constant dense<0.000000e+00> : vector<16x64xf32>
    %14 = tpu.matmul %11, %13, %cst_17 {dimension_numbers = #tpu.dot_dimension_numbers<[1], [0], [0], [1], [0, 0, 1, 1], [], []>} : vector<16x72xf32>, vector<72x64xf32>, vector<16x64xf32> -> vector<16x64xf32>
    %c8_18 = arith.constant 8 : index
    %c0_19 = arith.constant 0 : index
    %15 = vector.load %arg11[%c8_18, %c0_19] : memref<25x72xf32, #tpu.memory_space<vmem>>, vector<16x72xf32>
    %c1 = arith.constant 1 : index
    %c0_20 = arith.constant 0 : index
    %c0_21 = arith.constant 0 : index
    %16 = vector.load %arg2[%c1, %c0_20, %c0_21] : memref<3x72x64xf32, #tpu.memory_space<vmem>>, vector<1x72x64xf32>
    %17 = vector.shape_cast %16 : vector<1x72x64xf32> to vector<72x64xf32>
    %cst_22 = arith.constant dense<0.000000e+00> : vector<16x64xf32>
    %18 = tpu.matmul %15, %17, %cst_22 {dimension_numbers = #tpu.dot_dimension_numbers<[1], [0], [0], [1], [0, 0, 1, 1], [], []>} : vector<16x72xf32>, vector<72x64xf32>, vector<16x64xf32> -> vector<16x64xf32>
    %19 = arith.addf %14, %18 : vector<16x64xf32>
    %c9 = arith.constant 9 : index
    %c0_23 = arith.constant 0 : index
    %20 = vector.load %arg11[%c9, %c0_23] : memref<25x72xf32, #tpu.memory_space<vmem>>, vector<16x72xf32>
    %c2 = arith.constant 2 : index
    %c0_24 = arith.constant 0 : index
    %c0_25 = arith.constant 0 : index
    %21 = vector.load %arg2[%c2, %c0_24, %c0_25] : memref<3x72x64xf32, #tpu.memory_space<vmem>>, vector<1x72x64xf32>
    %22 = vector.shape_cast %21 : vector<1x72x64xf32> to vector<72x64xf32>
    %cst_26 = arith.constant dense<0.000000e+00> : vector<16x64xf32>
    %23 = tpu.matmul %20, %22, %cst_26 {dimension_numbers = #tpu.dot_dimension_numbers<[1], [0], [0], [1], [0, 0, 1, 1], [], []>} : vector<16x72xf32>, vector<72x64xf32>, vector<16x64xf32> -> vector<16x64xf32>
    %24 = arith.addf %19, %23 : vector<16x64xf32>
    %c0_27 = arith.constant 0 : index
    %c0_28 = arith.constant 0 : index
    %25 = vector.load %arg3[%c0_27, %c0_28] : memref<1x4xf32, #tpu.memory_space<vmem>>, vector<1x4xf32>
    %c0_29 = arith.constant 0 : index
    %c0_30 = arith.constant 0 : index
    %26 = vector.load %arg4[%c0_29, %c0_30] : memref<1x4xf32, #tpu.memory_space<vmem>>, vector<1x4xf32>
    %cst_31 = arith.constant dense<0.000000e+00> : vector<16x4xf32>
    %27 = tpu.matmul %24, %0, %cst_31 {dimension_numbers = #tpu.dot_dimension_numbers<[1], [0], [0], [1], [0, 0, 1, 1], [], []>} : vector<16x64xf32>, vector<64x4xf32>, vector<16x4xf32> -> vector<16x4xf32>
    %cst_32 = arith.constant dense<0.000000e+00> : vector<4xf32>
    %28 = vector.multi_reduction <add>, %27, %cst_32 [0] : vector<16x4xf32> to vector<4xf32>
    %29 = vector.shape_cast %28 : vector<4xf32> to vector<1x4xf32>
    %30 = arith.mulf %24, %24 : vector<16x64xf32>
    %cst_33 = arith.constant dense<0.000000e+00> : vector<16x4xf32>
    %31 = tpu.matmul %30, %0, %cst_33 {dimension_numbers = #tpu.dot_dimension_numbers<[1], [0], [0], [1], [0, 0, 1, 1], [], []>} : vector<16x64xf32>, vector<64x4xf32>, vector<16x4xf32> -> vector<16x4xf32>
    %cst_34 = arith.constant dense<0.000000e+00> : vector<4xf32>
    %32 = vector.multi_reduction <add>, %31, %cst_34 [0] : vector<16x4xf32> to vector<4xf32>
    %33 = vector.shape_cast %32 : vector<4xf32> to vector<1x4xf32>
    %cst_35 = arith.constant 3.906250e-03 : f32
    %34 = vector.broadcast %cst_35 : f32 to vector<1x4xf32>
    %35 = arith.mulf %29, %34 : vector<1x4xf32>
    %cst_36 = arith.constant 3.906250e-03 : f32
    %36 = vector.broadcast %cst_36 : f32 to vector<1x4xf32>
    %37 = arith.mulf %33, %36 : vector<1x4xf32>
    %38 = arith.mulf %35, %35 : vector<1x4xf32>
    %39 = arith.subf %37, %38 : vector<1x4xf32>
    %cst_37 = arith.constant 9.99999974E-6 : f32
    %40 = vector.broadcast %cst_37 : f32 to vector<1x4xf32>
    %41 = arith.addf %39, %40 : vector<1x4xf32>
    %42 = math.rsqrt %41 : vector<1x4xf32>
    %43 = arith.mulf %42, %25 : vector<1x4xf32>
    %44 = arith.mulf %35, %43 : vector<1x4xf32>
    %45 = arith.subf %26, %44 : vector<1x4xf32>
    %46 = vector.shape_cast %43 : vector<1x4xf32> to vector<1x4xf32>
    %47 = vector.broadcast %46 : vector<1x4xf32> to vector<16x4xf32>
    %cst_38 = arith.constant dense<0.000000e+00> : vector<16x64xf32>
    %48 = tpu.matmul %47, %1, %cst_38 {dimension_numbers = #tpu.dot_dimension_numbers<[1], [0], [0], [1], [0, 0, 1, 1], [], []>} : vector<16x4xf32>, vector<4x64xf32>, vector<16x64xf32> -> vector<16x64xf32>
    %49 = arith.mulf %24, %48 : vector<16x64xf32>
    %50 = vector.shape_cast %45 : vector<1x4xf32> to vector<1x4xf32>
    %51 = vector.broadcast %50 : vector<1x4xf32> to vector<16x4xf32>
    %cst_39 = arith.constant dense<0.000000e+00> : vector<16x64xf32>
    %52 = tpu.matmul %51, %1, %cst_39 {dimension_numbers = #tpu.dot_dimension_numbers<[1], [0], [0], [1], [0, 0, 1, 1], [], []>} : vector<16x4xf32>, vector<4x64xf32>, vector<16x64xf32> -> vector<16x64xf32>
    %53 = arith.addf %49, %52 : vector<16x64xf32>
    %cst_40 = arith.constant 0.000000e+00 : f32
    %54 = vector.broadcast %cst_40 : f32 to vector<16x64xf32>
    %55 = arith.maximumf %53, %54 : vector<16x64xf32>
    %c8_41 = arith.constant 8 : index
    %c4_42 = arith.constant 4 : index
    %56 = vector.load %arg11[%c8_41, %c4_42] : memref<25x72xf32, #tpu.memory_space<vmem>>, vector<16x64xf32>
    tpu.vector_store %arg11[%c8_41, %c4_42], %55 {strides = array<i32>} : memref<25x72xf32, #tpu.memory_space<vmem>>, vector<16x64xf32>,
    %c7_43 = arith.constant 7 : index
    %c0_44 = arith.constant 0 : index
    %57 = vector.load %arg11[%c7_43, %c0_44] : memref<25x72xf32, #tpu.memory_space<vmem>>, vector<16x72xf32>
    %c0_45 = arith.constant 0 : index
    %c0_46 = arith.constant 0 : index
    %c0_47 = arith.constant 0 : index
    %58 = vector.load %arg5[%c0_45, %c0_46, %c0_47] : memref<3x72x64xf32, #tpu.memory_space<vmem>>, vector<1x72x64xf32>
    %59 = vector.shape_cast %58 : vector<1x72x64xf32> to vector<72x64xf32>
    %cst_48 = arith.constant dense<0.000000e+00> : vector<16x64xf32>
    %60 = tpu.matmul %57, %59, %cst_48 {dimension_numbers = #tpu.dot_dimension_numbers<[1], [0], [0], [1], [0, 0, 1, 1], [], []>} : vector<16x72xf32>, vector<72x64xf32>, vector<16x64xf32> -> vector<16x64xf32>
    %c8_49 = arith.constant 8 : index
    %c0_50 = arith.constant 0 : index
    %61 = vector.load %arg11[%c8_49, %c0_50] : memref<25x72xf32, #tpu.memory_space<vmem>>, vector<16x72xf32>
    %c1_51 = arith.constant 1 : index
    %c0_52 = arith.constant 0 : index
    %c0_53 = arith.constant 0 : index
    %62 = vector.load %arg5[%c1_51, %c0_52, %c0_53] : memref<3x72x64xf32, #tpu.memory_space<vmem>>, vector<1x72x64xf32>
    %63 = vector.shape_cast %62 : vector<1x72x64xf32> to vector<72x64xf32>
    %cst_54 = arith.constant dense<0.000000e+00> : vector<16x64xf32>
    %64 = tpu.matmul %61, %63, %cst_54 {dimension_numbers = #tpu.dot_dimension_numbers<[1], [0], [0], [1], [0, 0, 1, 1], [], []>} : vector<16x72xf32>, vector<72x64xf32>, vector<16x64xf32> -> vector<16x64xf32>
    %65 = arith.addf %60, %64 : vector<16x64xf32>
    %c9_55 = arith.constant 9 : index
    %c0_56 = arith.constant 0 : index
    %66 = vector.load %arg11[%c9_55, %c0_56] : memref<25x72xf32, #tpu.memory_space<vmem>>, vector<16x72xf32>
    %c2_57 = arith.constant 2 : index
    %c0_58 = arith.constant 0 : index
    %c0_59 = arith.constant 0 : index
    %67 = vector.load %arg5[%c2_57, %c0_58, %c0_59] : memref<3x72x64xf32, #tpu.memory_space<vmem>>, vector<1x72x64xf32>
    %68 = vector.shape_cast %67 : vector<1x72x64xf32> to vector<72x64xf32>
    %cst_60 = arith.constant dense<0.000000e+00> : vector<16x64xf32>
    %69 = tpu.matmul %66, %68, %cst_60 {dimension_numbers = #tpu.dot_dimension_numbers<[1], [0], [0], [1], [0, 0, 1, 1], [], []>} : vector<16x72xf32>, vector<72x64xf32>, vector<16x64xf32> -> vector<16x64xf32>
    %70 = arith.addf %65, %69 : vector<16x64xf32>
    %c0_61 = arith.constant 0 : index
    %c0_62 = arith.constant 0 : index
    %71 = vector.load %arg6[%c0_61, %c0_62] : memref<1x4xf32, #tpu.memory_space<vmem>>, vector<1x4xf32>
    %c0_63 = arith.constant 0 : index
    %c0_64 = arith.constant 0 : index
    %72 = vector.load %arg7[%c0_63, %c0_64] : memref<1x4xf32, #tpu.memory_space<vmem>>, vector<1x4xf32>
    %cst_65 = arith.constant dense<0.000000e+00> : vector<16x4xf32>
    %73 = tpu.matmul %70, %0, %cst_65 {dimension_numbers = #tpu.dot_dimension_numbers<[1], [0], [0], [1], [0, 0, 1, 1], [], []>} : vector<16x64xf32>, vector<64x4xf32>, vector<16x4xf32> -> vector<16x4xf32>
    %cst_66 = arith.constant dense<0.000000e+00> : vector<4xf32>
    %74 = vector.multi_reduction <add>, %73, %cst_66 [0] : vector<16x4xf32> to vector<4xf32>
    %75 = vector.shape_cast %74 : vector<4xf32> to vector<1x4xf32>
    %76 = arith.mulf %70, %70 : vector<16x64xf32>
    %cst_67 = arith.constant dense<0.000000e+00> : vector<16x4xf32>
    %77 = tpu.matmul %76, %0, %cst_67 {dimension_numbers = #tpu.dot_dimension_numbers<[1], [0], [0], [1], [0, 0, 1, 1], [], []>} : vector<16x64xf32>, vector<64x4xf32>, vector<16x4xf32> -> vector<16x4xf32>
    %cst_68 = arith.constant dense<0.000000e+00> : vector<4xf32>
    %78 = vector.multi_reduction <add>, %77, %cst_68 [0] : vector<16x4xf32> to vector<4xf32>
    %79 = vector.shape_cast %78 : vector<4xf32> to vector<1x4xf32>
    %cst_69 = arith.constant 3.906250e-03 : f32
    %80 = vector.broadcast %cst_69 : f32 to vector<1x4xf32>
    %81 = arith.mulf %75, %80 : vector<1x4xf32>
    %cst_70 = arith.constant 3.906250e-03 : f32
    %82 = vector.broadcast %cst_70 : f32 to vector<1x4xf32>
    %83 = arith.mulf %79, %82 : vector<1x4xf32>
    %84 = arith.mulf %81, %81 : vector<1x4xf32>
    %85 = arith.subf %83, %84 : vector<1x4xf32>
    %cst_71 = arith.constant 9.99999974E-6 : f32
    %86 = vector.broadcast %cst_71 : f32 to vector<1x4xf32>
    %87 = arith.addf %85, %86 : vector<1x4xf32>
    %88 = math.rsqrt %87 : vector<1x4xf32>
    %89 = arith.mulf %88, %71 : vector<1x4xf32>
    %90 = arith.mulf %81, %89 : vector<1x4xf32>
    %91 = arith.subf %72, %90 : vector<1x4xf32>
    %c0_72 = arith.constant 0 : index
    %c0_73 = arith.constant 0 : index
    %c0_74 = arith.constant 0 : index
    %92 = vector.load %arg1[%c0_72, %c0_73, %c0_74] : memref<1x16x64xf32, #tpu.memory_space<vmem>>, vector<1x16x64xf32>
    %93 = vector.shape_cast %92 : vector<1x16x64xf32> to vector<16x64xf32>
    %94 = vector.shape_cast %89 : vector<1x4xf32> to vector<1x4xf32>
    %95 = vector.broadcast %94 : vector<1x4xf32> to vector<16x4xf32>
    %cst_75 = arith.constant dense<0.000000e+00> : vector<16x64xf32>
    %96 = tpu.matmul %95, %1, %cst_75 {dimension_numbers = #tpu.dot_dimension_numbers<[1], [0], [0], [1], [0, 0, 1, 1], [], []>} : vector<16x4xf32>, vector<4x64xf32>, vector<16x64xf32> -> vector<16x64xf32>
    %97 = arith.mulf %70, %96 : vector<16x64xf32>
    %98 = arith.addf %93, %97 : vector<16x64xf32>
    %99 = vector.shape_cast %91 : vector<1x4xf32> to vector<1x4xf32>
    %100 = vector.broadcast %99 : vector<1x4xf32> to vector<16x4xf32>
    %cst_76 = arith.constant dense<0.000000e+00> : vector<16x64xf32>
    %101 = tpu.matmul %100, %1, %cst_76 {dimension_numbers = #tpu.dot_dimension_numbers<[1], [0], [0], [1], [0, 0, 1, 1], [], []>} : vector<16x4xf32>, vector<4x64xf32>, vector<16x64xf32> -> vector<16x64xf32>
    %102 = arith.addf %98, %101 : vector<16x64xf32>
    %c0_77 = arith.constant 0 : index
    %c0_78 = arith.constant 0 : index
    %c0_79 = arith.constant 0 : index
    %103 = vector.load %arg10[%c0_77, %c0_78, %c0_79] : memref<1x16x64xf32, #tpu.memory_space<vmem>>, vector<1x16x64xf32>
    %104 = vector.shape_cast %103 : vector<1x16x64xf32> to vector<16x64xf32>
    %105 = vector.shape_cast %102 : vector<16x64xf32> to vector<1x16x64xf32>
    tpu.vector_store %arg10[%c0_77, %c0_78, %c0_79], %105 {strides = array<i32>} : memref<1x16x64xf32, #tpu.memory_space<vmem>>, vector<1x16x64xf32>,
    return
  }
  func.func @transform_0(%arg0: i32) -> (i32, i32, i32) {
    %c0_i32 = arith.constant 0 : i32
    %c0_i32_0 = arith.constant 0 : i32
    %c0_i32_1 = arith.constant 0 : i32
    return %arg0, %c0_i32, %c0_i32_0 : i32, i32, i32
  }
  func.func @transform_1(%arg0: i32) -> (i32, i32, i32) {
    %c0_i32 = arith.constant 0 : i32
    %c0_i32_0 = arith.constant 0 : i32
    %c0_i32_1 = arith.constant 0 : i32
    %c0_i32_2 = arith.constant 0 : i32
    return %c0_i32, %c0_i32_0, %c0_i32_1 : i32, i32, i32
  }
  func.func @transform_2(%arg0: i32) -> (i32, i32) {
    %c0_i32 = arith.constant 0 : i32
    %c0_i32_0 = arith.constant 0 : i32
    %c0_i32_1 = arith.constant 0 : i32
    return %c0_i32, %c0_i32_0 : i32, i32
  }
  func.func @transform_3(%arg0: i32) -> (i32, i32) {
    %c0_i32 = arith.constant 0 : i32
    %c0_i32_0 = arith.constant 0 : i32
    %c0_i32_1 = arith.constant 0 : i32
    return %c0_i32, %c0_i32_0 : i32, i32
  }
  func.func @transform_4(%arg0: i32) -> (i32, i32, i32) {
    %c0_i32 = arith.constant 0 : i32
    %c0_i32_0 = arith.constant 0 : i32
    %c0_i32_1 = arith.constant 0 : i32
    %c0_i32_2 = arith.constant 0 : i32
    return %c0_i32, %c0_i32_0, %c0_i32_1 : i32, i32, i32
  }
  func.func @transform_5(%arg0: i32) -> (i32, i32) {
    %c0_i32 = arith.constant 0 : i32
    %c0_i32_0 = arith.constant 0 : i32
    %c0_i32_1 = arith.constant 0 : i32
    return %c0_i32, %c0_i32_0 : i32, i32
  }
  func.func @transform_6(%arg0: i32) -> (i32, i32) {
    %c0_i32 = arith.constant 0 : i32
    %c0_i32_0 = arith.constant 0 : i32
    %c0_i32_1 = arith.constant 0 : i32
    return %c0_i32, %c0_i32_0 : i32, i32
  }
  func.func @transform_7(%arg0: i32) -> (i32, i32) {
    %c0_i32 = arith.constant 0 : i32
    %c0_i32_0 = arith.constant 0 : i32
    %c0_i32_1 = arith.constant 0 : i32
    return %c0_i32, %c0_i32_0 : i32, i32
  }
  func.func @transform_8(%arg0: i32) -> (i32, i32) {
    %c0_i32 = arith.constant 0 : i32
    %c0_i32_0 = arith.constant 0 : i32
    %c0_i32_1 = arith.constant 0 : i32
    return %c0_i32, %c0_i32_0 : i32, i32
  }
  func.func @transform_9(%arg0: i32) -> (i32, i32, i32) {
    %c0_i32 = arith.constant 0 : i32
    %c0_i32_0 = arith.constant 0 : i32
    %c0_i32_1 = arith.constant 0 : i32
    return %arg0, %c0_i32, %c0_i32_0 : i32, i32, i32
  }
}

</mosaic_0001>

<bundles_post_ra>
// kernel: residual_block.1
= control target key start
LH: loop header
LB: loop body
LE: loop exit
PB: predicated region body
PF: predicated region fallthrough
CT: control target
= control target key end

     0   :  { %s2388_s30 = smov 0   ;;  %s2745_s0 = inlined_call_operand.vmem [shape: f32[2,16,64], index: 0, kind: input, shape index: {}]   ;;  %s2746_s1 = inlined_call_operand.vmem [shape: f32[3,72,64], index: 1, kind: input, shape index: {}]   ;;  %s2747_s2 = inlined_call_operand.vmem [shape: f32[1,4], index: 2, kind: input, shape index: {}]   ;;  %s2748_s3 = inlined_call_operand.vmem [shape: f32[1,4], index: 3, kind: input, shape index: {}]   ;;  %s2749_s4 = inlined_call_operand.vmem [shape: f32[3,72,64], index: 4, kind: input, shape index: {}]   ;;  %s2750_s5 = inlined_call_operand.vmem [shape: f32[1,4], index: 5, kind: input, shape index: {}]   ;;  %s2751_s6 = inlined_call_operand.vmem [shape: f32[1,4], index: 6, kind: input, shape index: {}]   ;;  %s2752_s7 = inlined_call_operand.vmem [shape: f32[64,4], index: 7, kind: input, shape index: {}]   ;;  %s2753_s8 = inlined_call_operand.vmem [shape: f32[4,64], index: 8, kind: input, shape index: {}]   ;;  %s2754_s9 = inlined_call_operand.vmem [shape: f32[2,16,64], index: 9, kind: output, shape index: {}]  }
   0x1 LB: > { %s1725_s10 = sadd.s32 4294967295, %s2334_s30   ;;  %p1729_p0 = scmp.ge.s32.totalorder %s2334_s30, 1  ;;  %s2334_s30 = sphi %s2388_s30, %s19_s30  }
   0x2   : > { %p287_p1 = scmp.lt.s32.totalorder %s2334_s30, 3 }
   0x4   : > { %p288_p2 = pnand %p1729_p0, %p287_p1 }
   0x5   : > { %p323_p3 = scmp.lt.s32.totalorder (!%p288_p2), %s1725_s10, 1  ;;  %v1734_v0 = vld [vmem:[%s2746_s1 + $0x48] sm:$0xff] (!%p288_p2)  ;;  %v1735_v1 = vld [vmem:[%s2746_s1 + $0x50] sm:$0xff] (!%p288_p2)  ;;  %v1736_v2 = vld [vmem:[%s2746_s1 + $0x58] sm:$0xff] (!%p288_p2)  ;;  %vm342_vm0 = vcmask (!%p288_p2), 581632   ;;  %vm345_vm1 = vcmask (!%p288_p2), 31744  }
   0x6   : > { %291 = sbr.rel (%p288_p2) target bundleno = 1744 (0x6d0), region = 56  ;;  %v2146_v3 = vpack.c.bf16 (!%p288_p2), %v1735_v1, %v1734_v0  ;;  %v1737_v4 = vld [vmem:[%s2746_s1 + $0x60] sm:$0xff] (!%p288_p2)  ;;  %vm348_vm2 = vcmask (!%p288_p2), 589344   ;;  %v2336_v6 = vmov (!%p288_p2), 0.0   ;;  %v1738_v7 = vld [vmem:[%s2746_s1 + $0x68] sm:$0xff] (!%p288_p2)  ;;  %v1739_v8 = vld [vmem:[%s2746_s1 + $0x70] sm:$0xff] (!%p288_p2) }
   0x7   : > { %v2150_v5 = vpack.c.bf16 (!%p288_p2), %v1737_v4, %v1736_v2  ;;  %343 = vst.msk [vmem:[#allocation2 + $0x7] sm:$0x1] (!%p288_p2), %vm342_vm0, %v2336_v6  ;;  %344 = vst.msk [vmem:[#allocation2 + $0x18] sm:$0x1] (!%p288_p2), %vm342_vm0, %v2336_v6  ;;  %v2154_v9 = vpack.c.bf16 (!%p288_p2), %v1739_v8, %v1738_v7  ;;  %v1740_v11 = vld [vmem:[%s2746_s1 + $0x78] sm:$0xff] (!%p288_p2)  ;;  %v1741_v12 = vld [vmem:[%s2746_s1 + $0x80] sm:$0xff] (!%p288_p2) }
   0x8   : > { %346 = vst.msk [vmem:[#allocation2 + $0x8] sm:$0xff] (!%p288_p2), %vm345_vm1, %v2336_v6  ;;  %347 = vst.msk [vmem:[#allocation2 + $0x10] sm:$0xff] (!%p288_p2), %vm345_vm1, %v2336_v6  ;;  %2147 = vmatprep.subr.bf16.mxu0 (!%p288_p2), %v2146_v3  ;;  %s2337_s12 = smov (!%p288_p2), 4   ;;  %v2158_v14 = vpack.c.bf16 (!%p288_p2), %v1741_v12, %v1740_v11  ;;  %v1742_v15 = vld [vmem:[%s2746_s1 + $0x88] sm:$0xff] (!%p288_p2)  ;;  %v366_v16 = vld [vmem:[%s2746_s1] sm:$0xff] (!%p288_p2)  ;;  %vm361_vm3 = vcmask (!%p288_p2), 556064  }
   0x9   : > { %349 = vst.msk [vmem:[#allocation2 + $0x8] sm:$0xff] (!%p288_p2), %vm348_vm2, %v2336_v6  ;;  %350 = vst.msk [vmem:[#allocation2 + $0x10] sm:$0xff] (!%p288_p2), %vm348_vm2, %v2336_v6  ;;  %2149 = vmatpush3.bf16.msra.mxu0 (!%p288_p2), %v2146_v3  ;;  %v367_v17 = vld [vmem:[%s2746_s1 + $0x8] sm:$0xff] (!%p288_p2)  ;;  %v333_v19 = vld [vmem:[%s2752_s7] sm:$0xff] (!%p288_p2)  ;;  %vm387_vm4 = vcmask (!%p288_p2), 588800   ;;  %vm647_vm5 = vcmask (!%p288_p2), 523264  }
   0xa   : > { %2151 = vmatprep.subr.bf16.mxu0 (!%p288_p2), %v2150_v5  ;;  %v2162_v18 = vpack.c.bf16 (!%p288_p2), %v367_v17, %v366_v16  ;;  %v334_v20 = vld [vmem:[%s2752_s7 + $0x8] sm:$0xff] (!%p288_p2)  ;;  %v335_v21 = vld [vmem:[%s2752_s7 + $0x10] sm:$0xff] (!%p288_p2)  ;;  %v336_v23 = vld [vmem:[%s2752_s7 + $0x18] sm:$0xff] (!%p288_p2)  ;;  %vm846_vm6 = vcmask (!%p288_p2), 1043456  }
   0xb   : > { %v2456_v22 = vpack.c.bf16 (!%p288_p2), %v334_v20, %v333_v19  ;;  %v2461_v24 = vpack.c.bf16 (!%p288_p2), %v336_v23, %v335_v21  ;;  %v337_v25 = vld [vmem:[%s2752_s7 + $0x20] sm:$0xff] (!%p288_p2)  ;;  %v338_v26 = vld [vmem:[%s2752_s7 + $0x28] sm:$0xff] (!%p288_p2)  ;;  %v339_v28 = vld [vmem:[%s2752_s7 + $0x30] sm:$0xff] (!%p288_p2) }
   0xc   : > { %v2472_v27 = vpack.c.bf16 (!%p288_p2), %v338_v26, %v337_v25  ;;  %v340_v29 = vld [vmem:[%s2752_s7 + $0x38] sm:$0xff] (!%p288_p2)  ;;  %v368_v34 = vld [vmem:[%s2746_s1 + $0x10] sm:$0xff] (!%p288_p2)  ;;  %v370_v38 = vld [vmem:[%s2746_s1 + $0x20] sm:$0xff] (!%p288_p2) }
   0xd   : > { %s2756_s10 = smov (!%p323_p3, %s1725_s10), 1  ;;  %2153 = vmatpush3.bf16.msra.mxu0 %v2150_v5  ;;  %2195 = vmatprep.subr.bf16.mxu1 %v2456_v22  ;;  %v2482_v30 = vpack.c.bf16 %v340_v29, %v339_v28  ;;  %v369_v35 = vld [vmem:[%s2746_s1 + $0x18] sm:$0xff]  ;;  %v371_v39 = vld [vmem:[%s2746_s1 + $0x28] sm:$0xff]  ;;  %v372_v42 = vld [vmem:[%s2746_s1 + $0x30] sm:$0xff] }
   0xe   : > { %s1804_s23 = sshll.u32 %s2756_s10, 4  ;;  %2155 = vmatprep.subr.bf16.mxu0 %v2154_v9  ;;  %2197 = vmatpush3.bf16.msra.mxu1 %v2456_v22  ;;  %v2166_v36 = vpack.c.bf16 %v369_v35, %v368_v34  ;;  %v2170_v41 = vpack.c.bf16 %v371_v39, %v370_v38  ;;  %v373_v43 = vld [vmem:[%s2746_s1 + $0x38] sm:$0xff]  ;;  %v374_v45 = vld [vmem:[%s2746_s1 + $0x40] sm:$0xff]  ;;  %v1747_v46 = vld [vmem:[%s2746_s1 + $0x90] sm:$0xff] }
   0xf   : > { %s327_s26 = scalar_lea.vmem %s2745_s0, %s1804_s23  ;;  %2199 = vmatprep.subr.bf16.mxu1 %v2461_v24  ;;  %v2174_v44 = vpack.c.bf16 %v373_v43, %v372_v42  ;;  %v1748_v47 = vld [vmem:[%s2746_s1 + $0x98] sm:$0xff]  ;;  %v1749_v48 = vld [vmem:[%s2746_s1 + $0xa0] sm:$0xff]  ;;  %v1750_v49 = vld [vmem:[%s2746_s1 + $0xa8] sm:$0xff]  ;;  %s332_s11 = scalar_lea.vmem %s2754_s9, %s1804_s23 }
  0x10   : > { %v2424_v10 = vld [vmem:[%s327_s26] sm:$0xff]  ;;  %v2434_v13 = vld [vmem:[%s327_s26 + $0x8] sm:$0xff]  ;;  %v2178_v50 = vpack.c.bf16 %v1748_v47, %v1747_v46  ;;  %v2182_v51 = vpack.c.bf16 %v1750_v49, %v1749_v48  ;;  %v1751_v53 = vld [vmem:[%s2746_s1 + $0xb0] sm:$0xff] }
  0x11   : > { %355 = vrot.lane.b32.xlu0 %v2424_v10, %s2337_s12  ;;  %2157 = vmatpush3.bf16.msra.mxu0 %v2154_v9  ;;  %v1752_v54 = vld [vmem:[%s2746_s1 + $0xb8] sm:$0xff]  ;;  %v1753_v57 = vld [vmem:[%s2746_s1 + $0xc0] sm:$0xff]  ;;  %v1754_v58 = vld [vmem:[%s2746_s1 + $0xc8] sm:$0xff] }
  0x12   : > { %2159 = vmatprep.subr.bf16.mxu0 %v2158_v14  ;;  %2201 = vmatpush3.bf16.msra.mxu1 %v2461_v24  ;;  %v2186_v56 = vpack.c.bf16 %v1752_v54, %v1751_v53  ;;  %v2190_v59 = vpack.c.bf16 %v1754_v58, %v1753_v57  ;;  %v1755_v60 = vld [vmem:[%s2746_s1 + $0xd0] sm:$0xff]  ;;  %v2577_v2 = vld [vmem:[%s2753_s8] sm:$0xf]  ;;  %v1768_v47 = vld [vmem:[%s2749_s4 + $0x48] sm:$0xff] }
  0x13   : > { %2203 = vmatprep.subr.bf16.mxu1 %v2472_v27  ;;  %v645_v38 = vld [vmem:[%s2747_s2] sm:$0x1]  ;;  %v1769_v48 = vld [vmem:[%s2749_s4 + $0x50] sm:$0xff]  ;;  %v1770_v49 = vld [vmem:[%s2749_s4 + $0x58] sm:$0xff] }
  0x14   : > { %v646_v42 = vld [vmem:[%s2748_s3] sm:$0x1]  ;;  %v1772_v53 = vld [vmem:[%s2749_s4 + $0x68] sm:$0xff]  ;;  %v1773_v54 = vld [vmem:[%s2749_s4 + $0x70] sm:$0xff] }
  0x15   : > { %357 = vrot.lane.b32.xlu0 %v2434_v13, %s2337_s12  ;;  %2161 = vmatpush3.bf16.msra.mxu0 %v2158_v14  ;;  %v1775_v57 = vld [vmem:[%s2749_s4 + $0x80] sm:$0xff] }
  0x16   : > { %1940 = vmatprep.subr.mxu0 %v1742_v15  ;;  %2205 = vmatpush3.bf16.msra.mxu1 %v2472_v27 }
  0x17   : > { %2207 = vmatprep.subr.bf16.mxu1 %v2482_v30 }
  0x19   : > { %1941 = vmatpush3.msra.mxu0 %v1742_v15 }
  0x1a   : > { %2163 = vmatprep.subr.bf16.mxu0 %v2162_v18  ;;  %2209 = vmatpush3.bf16.msra.mxu1 %v2482_v30 }
  0x1b   : > { %2211 = vmatprep.subr.bf16.mxu1 %v2456_v22 }
  0x83   : > { %v356_v31 = vpop.permute.xlu0 %355 }
  0x84   : > { %362 = vst.msk [vmem:[#allocation2 + $0x8] sm:$0xff] %vm361_vm3, %v356_v31 }
  0x87   : > { %v358_v32 = vpop.permute.xlu0 %357 }
  0x88   : > { %363 = vst.msk [vmem:[#allocation2 + $0x10] sm:$0xff] %vm361_vm3, %v358_v32 }
  0x8b   : > { %v375_v33 = vld [vmem:[#allocation2 + $0x8] sm:$0xff] }
  0x8c   : > { %1942 = vmatprep.mubr.msk.f32.mxu0 %vm387_vm4, %v375_v33  ;;  %v364_v40 = vld [vmem:[#allocation2 + $0x7] sm:$0xff] }
  0x8f   : > { %v376_v37 = vld [vmem:[#allocation2 + $0x10] sm:$0xff] }
  0x90   : > { %1943 = vmatmul.mubr.msk.f32.vlgmr.msra.gmra.mrb[0].mxu0 %vm387_vm4, %v376_v37  ;;  %v365_v52 = vld [vmem:[#allocation2 + $0xf] sm:$0xff] }
  0x91   : > { %2165 = vmatpush3.bf16.msra.mxu0 %v2162_v18  ;;  %1963 = vmatprep.mubr.msk.f32.mxu0 %vm387_vm4, %v364_v40  ;;  %v550_v55 = vld [vmem:[#allocation2 + $0x9] sm:$0xff]  ;;  %v551_v61 = vld [vmem:[#allocation2 + $0x11] sm:$0xff] }
  0x92   : > { %2167 = vmatprep.subr.bf16.mxu0 %v2166_v36 }
  0x95   : > { %2169 = vmatpush3.bf16.msra.mxu0 %v2166_v36  ;;  %v839_v36 = vlaneseq }
  0x96   : > { %2171 = vmatprep.subr.bf16.mxu0 %v2170_v41 }
  0x97   : > { %v840_v37 = vshrl.u32 %v839_v36, 7 }
  0x99   : > { %2173 = vmatpush3.bf16.msra.mxu0 %v2170_v41  ;;  %v2592_v39 = vsub.s32 0, %v840_v37 }
  0x9a   : > { %2175 = vmatprep.subr.bf16.mxu0 %v2174_v44 }
  0x9d   : > { %2177 = vmatpush3.bf16.msra.mxu0 %v2174_v44 }
  0x9e   : > { %1961 = vmatprep.subr.mxu0 %v374_v45 }
  0xa1   : > { %1962 = vmatpush3.msra.mxu0 %v374_v45 }
  0xa2   : > { %1964 = vmatmul.mubr.msk.f32.vlgmr.msra.gmra.mrb[0].mxu0 %vm387_vm4, %v365_v52  ;;  %2179 = vmatprep.subr.bf16.mxu0 %v2178_v50 }
  0xa3   : > { %2181 = vmatpush3.bf16.msra.mxu0 %v2178_v50  ;;  %1984 = vmatprep.mubr.msk.f32.mxu0 %vm387_vm4, %v550_v55  ;;  %v2226_v50 = vpack.c.bf16 %v1769_v48, %v1768_v47  ;;  %v2234_v55 = vpack.c.bf16 %v1773_v54, %v1772_v53 }
  0xa4   : > { %2183 = vmatprep.subr.bf16.mxu0 %v2182_v51 }
  0xa7   : > { %2185 = vmatpush3.bf16.msra.mxu0 %v2182_v51  ;;  %v1771_v51 = vld [vmem:[%s2749_s4 + $0x60] sm:$0xff] }
  0xa8   : > { %2187 = vmatprep.subr.bf16.mxu0 %v2186_v56  ;;  %v2230_v52 = vpack.c.bf16 %v1771_v51, %v1770_v49 }
  0xab   : > { %2189 = vmatpush3.bf16.msra.mxu0 %v2186_v56  ;;  %v1774_v56 = vld [vmem:[%s2749_s4 + $0x78] sm:$0xff] }
  0xac   : > { %2191 = vmatprep.subr.bf16.mxu0 %v2190_v59 }
  0xaf   : > { %2193 = vmatpush3.bf16.msra.mxu0 %v2190_v59  ;;  %v2238_v59 = vpack.c.bf16 %v1775_v57, %v1774_v56 }
  0xb0   : > { %1982 = vmatprep.subr.mxu0 %v1755_v60 }
  0xb3   : > { %1983 = vmatpush3.msra.mxu0 %v1755_v60 }
  0xb4   : > { %1985 = vmatmul.mubr.msk.f32.vlgmr.msra.gmra.mrb[0].mxu0 %vm387_vm4, %v551_v61  ;;  %2275 = vmatprep.subr.bf16.mxu0 %v2456_v22 }
  0xb5   : > { %2277 = vmatpush3.bf16.msra.mxu0 %v2456_v22 }
  0xb6   : > { %2279 = vmatprep.subr.bf16.mxu0 %v2461_v24 }
  0xb9   : > { %2281 = vmatpush3.bf16.msra.mxu0 %v2461_v24 }
  0xba   : > { %2283 = vmatprep.subr.bf16.mxu0 %v2472_v27 }
  0xbd   : > { %2285 = vmatpush3.bf16.msra.mxu0 %v2472_v27 }
  0xbe   : > { %2287 = vmatprep.subr.bf16.mxu0 %v2482_v30 }
  0xc1   : > { %2289 = vmatpush3.bf16.msra.mxu0 %v2482_v30 }
  0xc2   : > { %2291 = vmatprep.subr.bf16.mxu0 %v2456_v22 }
 0x187   : > { %v2553_v62 = vpop.f32.mrb[0].mxu0 }
 0x188   : > { %v2555_v63 = vpop.f32.mrb[1].mxu0  ;;  %v739_v1 = vmul.f32 %v2553_v62, %v2553_v62 }
 0x189   : > { %v738_v0 = vmul.f32 %v2555_v63, %v2555_v63  ;;  %2003 = vmatprep.mubr.msk.f32.mxu1 %vm647_vm5, %v2555_v63 }
 0x18a   : > { %2004 = vmatmul.mubr.msk.f32.vlgmr.msra.gmra.mrb[0].mxu1 %vm647_vm5, %v2553_v62 }
 0x18b   : > { %2213 = vmatpush3.bf16.msra.mxu1 %v2456_v22  ;;  %2022 = vmatprep.mubr.msk.f32.mxu1 %vm647_vm5, %v738_v0 }
 0x18c   : > { %2215 = vmatprep.subr.bf16.mxu1 %v2461_v24 }
 0x18f   : > { %2217 = vmatpush3.bf16.msra.mxu1 %v2461_v24 }
 0x190   : > { %2219 = vmatprep.subr.bf16.mxu1 %v2472_v27 }
 0x193   : > { %2221 = vmatpush3.bf16.msra.mxu1 %v2472_v27 }
 0x194   : > { %2223 = vmatprep.subr.bf16.mxu1 %v2482_v30 }
 0x197   : > { %2225 = vmatpush3.bf16.msra.mxu1 %v2482_v30 }
 0x198   : > { %2025 = vmatprep.subr.msk.mxu1 %vm846_vm6, %v2577_v2 }
 0x19a   : > { %2023 = vmatmul.mubr.msk.f32.vlgmr.msra.gmra.mrb[2].mxu1 %vm647_vm5, %v739_v1 }
 0x19b   : > { %2026 = vmatpush3.msk.msra.mxu1 %vm846_vm6, %v2577_v2 }
 0x19c   : > { %2030 = vmatprep.subr.msk.mxu1 %vm846_vm6, %v2577_v2 }
 0x25d   : > { %v2005_v3 = vpop.f32.mrb[0].mxu1 }
 0x25e   : > { %v730_v4 = vsel %vm345_vm1, %v2005_v3, 0.0  ;;  %v720_v5 = vpop.f32.mrb[1].mxu1 }
 0x25f   : > { %v729_v6 = vsel %vm345_vm1, %v720_v5, 0.0  ;;  %v1776_v5 = vld [vmem:[%s2749_s4 + $0x88] sm:$0xff] }
 0x260   : > { %v731_v7 = vadd.f32 %v730_v4, %v729_v6  ;;  %v1025_v6 = vld [vmem:[%s2749_s4] sm:$0xff] }
 0x262   : > { %v732_v8 = vrot.slane %v731_v7, 4 }
 0x264   : > { %v733_v9 = vadd.f32 %v732_v8, %v731_v7 }
 0x266   : > { %v734_v11 = vrot.slane %v733_v9, 2 }
 0x268   : > { %v735_v14 = vadd.f32 %v734_v11, %v733_v9 }
 0x26a   : > { %v736_v19 = vrot.slane %v735_v14, 1 }
 0x26c   : > { %v737_v23 = vadd.f32 %v736_v19, %v735_v14  ;;  %v1029_v19 = vld [vmem:[%s2749_s4 + $0x20] sm:$0xff] }
 0x26d   : > { %v2024_v12 = vpop.f32.mrb[2].mxu1 }
 0x26e   : > { %v822_v15 = vsel %vm345_vm1, %v2024_v12, 0.0  ;;  %v812_v16 = vpop.f32.mrb[3].mxu1  ;;  %v830_v28 = vmul.f32 0.00390625, %v737_v23 }
 0x26f   : > { %v821_v17 = vsel %vm345_vm1, %v812_v16, 0.0  ;;  %v1028_v16 = vld [vmem:[%s2749_s4 + $0x18] sm:$0xff] }
 0x270   : > { %v823_v18 = vadd.f32 %v822_v15, %v821_v17  ;;  %v832_v32 = vmul.f32 %v830_v28, %v830_v28  ;;  %v1027_v15 = vld [vmem:[%s2749_s4 + $0x10] sm:$0xff] }
 0x271   : > { %v2246_v17 = vpack.c.bf16 %v1028_v16, %v1027_v15 }
 0x272   : > { %v824_v20 = vrot.slane %v823_v18, 4 }
 0x274   : > { %v825_v21 = vadd.f32 %v824_v20, %v823_v18  ;;  %v1030_v20 = vld [vmem:[%s2749_s4 + $0x28] sm:$0xff] }
 0x275   : > { %v2250_v23 = vpack.c.bf16 %v1030_v20, %v1029_v19 }
 0x276   : > { %v826_v25 = vrot.slane %v825_v21, 2 }
 0x278   : > { %v827_v26 = vadd.f32 %v826_v25, %v825_v21  ;;  %v1031_v25 = vld [vmem:[%s2749_s4 + $0x30] sm:$0xff] }
 0x27a   : > { %v828_v29 = vrot.slane %v827_v26, 1 }
 0x27c   : > { %v829_v31 = vadd.f32 %v828_v29, %v827_v26  ;;  %v1032_v26 = vld [vmem:[%s2749_s4 + $0x38] sm:$0xff]  ;;  %v1033_v29 = vld [vmem:[%s2749_s4 + $0x40] sm:$0xff] }
 0x27e   : > { %v831_v33 = vmul.f32 0.00390625, %v829_v31  ;;  %v1781_v31 = vld [vmem:[%s2749_s4 + $0x90] sm:$0xff] }
 0x280   : > { %v833_v34 = vsub.f32 %v831_v33, %v832_v32  ;;  %v1782_v32 = vld [vmem:[%s2749_s4 + $0x98] sm:$0xff]  ;;  %v1783_v33 = vld [vmem:[%s2749_s4 + $0xa0] sm:$0xff] }
 0x282   : > { %v834_v35 = vadd.f32 1e-05, %v833_v34  ;;  %v1784_v34 = vld [vmem:[%s2749_s4 + $0xa8] sm:$0xff] }
 0x283   : > { %v2262_v36 = vpack.c.bf16 %v1784_v34, %v1783_v33 }
 0x284   : > { %2324 = vrsqrt.f32 %v834_v35  ;;  %v2258_v35 = vpack.c.bf16 %v1782_v32, %v1781_v31 }
 0x28e   : > { %v2325_v40 = vpop.eup %2324 }
 0x28f   : > { %v836_v41 = vmul.f32 %v2325_v40, %v645_v38  ;;  %v1785_v38 = vld [vmem:[%s2749_s4 + $0xb0] sm:$0xff]  ;;  %v1786_v40 = vld [vmem:[%s2749_s4 + $0xb8] sm:$0xff] }
 0x291   : > { %v842_v43 = vrot.slane %v836_v41, %v2592_v39  ;;  %v837_v44 = vmul.f32 %v836_v41, %v830_v28  ;;  %v2254_v28 = vpack.c.bf16 %v1032_v26, %v1031_v25 }
 0x293   : > { %2027 = vmatprep.mubr.msk.f32.mxu1 %vm345_vm1, %v842_v43  ;;  %v838_v45 = vsub.f32 %v646_v42, %v837_v44  ;;  %v2266_v42 = vpack.c.bf16 %v1786_v40, %v1785_v38  ;;  %v1788_v44 = vld [vmem:[%s2749_s4 + $0xc8] sm:$0xff] }
 0x294   : > { %2028 = vmatmul.mubr.msk.f32.vlgmr.msra.gmra.mrb[4].mxu1 %vm345_vm1, %v842_v43  ;;  %v1787_v43 = vld [vmem:[%s2749_s4 + $0xc0] sm:$0xff] }
 0x295   : > { %2031 = vmatpush3.msk.msra.mxu1 %vm846_vm6, %v2577_v2  ;;  %v931_v46 = vrot.slane %v838_v45, %v2592_v39  ;;  %v2270_v45 = vpack.c.bf16 %v1788_v44, %v1787_v43 }
 0x296   : > { %2227 = vmatprep.subr.bf16.mxu1 %v2226_v50 }
 0x297   : > { %2032 = vmatprep.mubr.msk.f32.mxu1 %vm345_vm1, %v931_v46 }
 0x298   : > { %2033 = vmatmul.mubr.msk.f32.vlgmr.msra.gmra.mrb[6].mxu1 %vm345_vm1, %v931_v46  ;;  %v1789_v46 = vld [vmem:[%s2749_s4 + $0xd0] sm:$0xff] }
 0x299   : > { %2229 = vmatpush3.bf16.msra.mxu1 %v2226_v50 }
 0x29a   : > { %2231 = vmatprep.subr.bf16.mxu1 %v2230_v52 }
 0x29d   : > { %2233 = vmatpush3.bf16.msra.mxu1 %v2230_v52 }
 0x29e   : > { %2235 = vmatprep.subr.bf16.mxu1 %v2234_v55 }
 0x2a1   : > { %2237 = vmatpush3.bf16.msra.mxu1 %v2234_v55 }
 0x2a2   : > { %2239 = vmatprep.subr.bf16.mxu1 %v2238_v59 }
 0x2a5   : > { %2241 = vmatpush3.bf16.msra.mxu1 %v2238_v59 }
 0x2a6   : > { %2051 = vmatprep.subr.mxu1 %v1776_v5 }
 0x2a9   : > { %2052 = vmatpush3.msra.mxu1 %v1776_v5 }
 0x367   : > { %v2029_v58 = vpop.f32.mrb[4].mxu1 }
 0x368   : > { %v926_v60 = vmul.f32 %v2029_v58, %v2553_v62  ;;  %v916_v61 = vpop.f32.mrb[5].mxu1  ;;  %v1026_v62 = vld [vmem:[%s2749_s4 + $0x8] sm:$0xff] }
 0x369   : > { %v925_v0 = vmul.f32 %v916_v61, %v2555_v63  ;;  %v2242_v63 = vpack.c.bf16 %v1026_v62, %v1025_v6 }
 0x36b   : > { %v2034_v1 = vpop.f32.mrb[6].mxu1  ;;  %2243 = vmatprep.subr.bf16.mxu1 %v2242_v63 }
 0x36c   : > { %v1010_v3 = vadd.f32 %v2034_v1, %v926_v60  ;;  %v1000_v4 = vpop.f32.mrb[7].mxu1 }
 0x36d   : > { %v1009_v7 = vadd.f32 %v1000_v4, %v925_v0 }
 0x36e   : > { %v1012_v9 = vmax.f32 %v1010_v3, 0.0 }
 0x36f   : > { %v1011_v8 = vmax.f32 %v1009_v7, 0.0 }
 0x371   : > { %1015 = vrot.lane.b32.xlu1 %v1011_v8, %s2337_s12 }
 0x375   : > { %1017 = vrot.lane.b32.xlu1 %v1012_v9, %s2337_s12 }
 0x3e3   : > { %v1016_v11 = vpop.permute.xlu1 %1015 }
 0x3e4   : > { %1021 = vst.msk [vmem:[#allocation2 + $0x8] sm:$0xff] %vm361_vm3, %v1016_v11 }
 0x3e7   : > { %v1018_v12 = vpop.permute.xlu1 %1017 }
 0x3e8   : > { %1022 = vst.msk [vmem:[#allocation2 + $0x10] sm:$0xff] %vm361_vm3, %v1018_v12 }
 0x3eb   : > { %v1034_v14 = vld [vmem:[#allocation2 + $0x8] sm:$0xff] }
 0x3ec   : > { %2053 = vmatprep.mubr.msk.f32.mxu1 %vm387_vm4, %v1034_v14  ;;  %v1023_v21 = vld [vmem:[#allocation2 + $0x7] sm:$0xff]  ;;  %v1303_v14 = vld [vmem:[%s2750_s5] sm:$0x1] }
 0x3ef   : > { %v1035_v18 = vld [vmem:[#allocation2 + $0x10] sm:$0xff] }
 0x3f0   : > { %2054 = vmatmul.mubr.msk.f32.vlgmr.msra.gmra.mrb[8].mxu1 %vm387_vm4, %v1035_v18  ;;  %v1024_v37 = vld [vmem:[#allocation2 + $0xf] sm:$0xff] }
 0x3f1   : > { %2245 = vmatpush3.bf16.msra.mxu1 %v2242_v63  ;;  %2074 = vmatprep.mubr.msk.f32.mxu1 %vm387_vm4, %v1023_v21  ;;  %v1208_v41 = vld [vmem:[#allocation2 + $0x9] sm:$0xff]  ;;  %v1209_v47 = vld [vmem:[#allocation2 + $0x11] sm:$0xff] }
 0x3f2   : > { %2247 = vmatprep.subr.bf16.mxu1 %v2246_v17 }
 0x3f5   : > { %2249 = vmatpush3.bf16.msra.mxu1 %v2246_v17  ;;  %v1304_v17 = vld [vmem:[%s2751_s6] sm:$0x1] }
 0x3f6   : > { %2251 = vmatprep.subr.bf16.mxu1 %v2250_v23 }
 0x3f9   : > { %2253 = vmatpush3.bf16.msra.mxu1 %v2250_v23 }
 0x3fa   : > { %2255 = vmatprep.subr.bf16.mxu1 %v2254_v28 }
 0x3fd   : > { %2257 = vmatpush3.bf16.msra.mxu1 %v2254_v28 }
 0x3fe   : > { %2072 = vmatprep.subr.mxu1 %v1033_v29 }
 0x401   : > { %2073 = vmatpush3.msra.mxu1 %v1033_v29 }
 0x402   : > { %2075 = vmatmul.mubr.msk.f32.vlgmr.msra.gmra.mrb[8].mxu1 %vm387_vm4, %v1024_v37  ;;  %2259 = vmatprep.subr.bf16.mxu1 %v2258_v35 }
 0x403   : > { %2261 = vmatpush3.bf16.msra.mxu1 %v2258_v35  ;;  %2095 = vmatprep.mubr.msk.f32.mxu1 %vm387_vm4, %v1208_v41 }
 0x404   : > { %2263 = vmatprep.subr.bf16.mxu1 %v2262_v36 }
 0x407   : > { %2265 = vmatpush3.bf16.msra.mxu1 %v2262_v36 }
 0x408   : > { %2267 = vmatprep.subr.bf16.mxu1 %v2266_v42 }
 0x40b   : > { %2269 = vmatpush3.bf16.msra.mxu1 %v2266_v42 }
 0x40c   : > { %2271 = vmatprep.subr.bf16.mxu1 %v2270_v45 }
 0x40f   : > { %2273 = vmatpush3.bf16.msra.mxu1 %v2270_v45 }
 0x410   : > { %2093 = vmatprep.subr.mxu1 %v1789_v46 }
 0x413   : > { %2094 = vmatpush3.msra.mxu1 %v1789_v46 }
 0x414   : > { %2096 = vmatmul.mubr.msk.f32.vlgmr.msra.gmra.mrb[8].mxu1 %vm387_vm4, %v1209_v47 }
 0x4e7   : > { %v2097_v48 = vpop.f32.mrb[8].mxu1 }
 0x4e8   : > { %v1292_v49 = vpop.f32.mrb[9].mxu1  ;;  %v1396_v51 = vmul.f32 %v2097_v48, %v2097_v48 }
 0x4e9   : > { %v1395_v50 = vmul.f32 %v1292_v49, %v1292_v49  ;;  %2114 = vmatprep.mubr.msk.f32.mxu0 %vm647_vm5, %v1292_v49 }
 0x4ea   : > { %2115 = vmatmul.mubr.msk.f32.vlgmr.msra.gmra.mrb[2].mxu0 %vm647_vm5, %v2097_v48 }
 0x4eb   : > { %2293 = vmatpush3.bf16.msra.mxu0 %v2456_v22  ;;  %2133 = vmatprep.mubr.msk.f32.mxu0 %vm647_vm5, %v1395_v50 }
 0x4ec   : > { %2295 = vmatprep.subr.bf16.mxu0 %v2461_v24 }
 0x4ef   : > { %2297 = vmatpush3.bf16.msra.mxu0 %v2461_v24 }
 0x4f0   : > { %2299 = vmatprep.subr.bf16.mxu0 %v2472_v27 }
 0x4f3   : > { %2301 = vmatpush3.bf16.msra.mxu0 %v2472_v27 }
 0x4f4   : > { %2303 = vmatprep.subr.bf16.mxu0 %v2482_v30 }
 0x4f7   : > { %2305 = vmatpush3.bf16.msra.mxu0 %v2482_v30 }
 0x4f8   : > { %2136 = vmatprep.subr.msk.mxu0 %vm846_vm6, %v2577_v2 }
 0x4fa   : > { %2134 = vmatmul.mubr.msk.f32.vlgmr.msra.gmra.mrb[4].mxu0 %vm647_vm5, %v1396_v51 }
 0x4fb   : > { %2137 = vmatpush3.msk.msra.mxu0 %vm846_vm6, %v2577_v2 }
 0x4fc   : > { %2141 = vmatprep.subr.msk.mxu0 %vm846_vm6, %v2577_v2 }
 0x5bd   : > { %v2116_v22 = vpop.f32.mrb[2].mxu0 }
 0x5be   : > { %v1387_v24 = vsel %vm345_vm1, %v2116_v22, 0.0  ;;  %v1377_v27 = vpop.f32.mrb[3].mxu0 }
 0x5bf   : > { %v1386_v52 = vsel %vm345_vm1, %v1377_v27, 0.0 }
 0x5c0   : > { %v1388_v53 = vadd.f32 %v1387_v24, %v1386_v52 }
 0x5c2   : > { %v1389_v30 = vrot.slane %v1388_v53, 4 }
 0x5c4   : > { %v1390_v54 = vadd.f32 %v1389_v30, %v1388_v53 }
 0x5c6   : > { %v1391_v55 = vrot.slane %v1390_v54, 2 }
 0x5c8   : > { %v1392_v57 = vadd.f32 %v1391_v55, %v1390_v54 }
 0x5ca   : > { %v1393_v0 = vrot.slane %v1392_v57, 1 }
 0x5cc   : > { %v1394_v4 = vadd.f32 %v1393_v0, %v1392_v57 }
 0x5cd   : > { %v2135_v56 = vpop.f32.mrb[4].mxu0 }
 0x5ce   : > { %v1479_v58 = vsel %vm345_vm1, %v2135_v56, 0.0  ;;  %v1469_v59 = vpop.f32.mrb[5].mxu0  ;;  %v1487_v62 = vmul.f32 0.00390625, %v1394_v4 }
 0x5cf   : > { %v1478_v60 = vsel %vm345_vm1, %v1469_v59, 0.0 }
 0x5d0   : > { %v1480_v61 = vadd.f32 %v1479_v58, %v1478_v60  ;;  %v1489_v8 = vmul.f32 %v1487_v62, %v1487_v62 }
 0x5d2   : > { %v1481_v1 = vrot.slane %v1480_v61, 4 }
 0x5d4   : > { %v1482_v3 = vadd.f32 %v1481_v1, %v1480_v61 }
 0x5d6   : > { %v1483_v5 = vrot.slane %v1482_v3, 2 }
 0x5d8   : > { %v1484_v6 = vadd.f32 %v1483_v5, %v1482_v3 }
 0x5da   : > { %v1485_v7 = vrot.slane %v1484_v6, 1 }
 0x5dc   : > { %v1486_v63 = vadd.f32 %v1485_v7, %v1484_v6 }
 0x5de   : > { %v1488_v9 = vmul.f32 0.00390625, %v1486_v63 }
 0x5e0   : > { %v1490_v11 = vsub.f32 %v1488_v9, %v1489_v8 }
 0x5e2   : > { %v1491_v12 = vadd.f32 1e-05, %v1490_v11 }
 0x5e4   : > { %2326 = vrsqrt.f32 %v1491_v12 }
 0x5ee   : > { %v2327_v15 = vpop.eup %2326 }
 0x5ef   : > { %v1493_v16 = vmul.f32 %v2327_v15, %v1303_v14 }
 0x5f1   : > { %v1501_v18 = vrot.slane %v1493_v16, %v2592_v39  ;;  %v1494_v19 = vmul.f32 %v1493_v16, %v1487_v62 }
 0x5f3   : > { %2138 = vmatprep.mubr.msk.f32.mxu0 %vm345_vm1, %v1501_v18  ;;  %v1495_v20 = vsub.f32 %v1304_v17, %v1494_v19 }
 0x5f4   : > { %2139 = vmatmul.mubr.msk.f32.vlgmr.msra.gmra.mrb[6].mxu0 %vm345_vm1, %v1501_v18 }
 0x5f5   : > { %2142 = vmatpush3.msk.msra.mxu0 %vm846_vm6, %v2577_v2  ;;  %v1588_v21 = vrot.slane %v1495_v20, %v2592_v39 }
 0x5f7   : > { %2143 = vmatprep.mubr.msk.f32.mxu0 %vm345_vm1, %v1588_v21 }
 0x5f8   : > { %2144 = vmatmul.mubr.msk.f32.vlgmr.msra.gmra.mrb[8].mxu0 %vm345_vm1, %v1588_v21 }
 0x6c7   : > { %v2140_v23 = vpop.f32.mrb[6].mxu0 }
 0x6c8   : > { %v1581_v25 = vmul.f32 %v2140_v23, %v2097_v48  ;;  %v1571_v26 = vpop.f32.mrb[7].mxu0 }
 0x6c9   : > { %v1580_v28 = vmul.f32 %v1571_v26, %v1292_v49 }
 0x6ca   : > { %v1583_v29 = vadd.f32 %v1581_v25, %v2434_v13 }
 0x6cb   : > { %v2145_v31 = vpop.f32.mrb[8].mxu0  ;;  %v1582_v2 = vadd.f32 %v1580_v28, %v2424_v10 }
 0x6cc   : > { %v1667_v32 = vadd.f32 %v2145_v31, %v1583_v29  ;;  %v1657_v39 = vpop.f32.mrb[9].mxu0 }
 0x6cd   : > { %v1666_v33 = vadd.f32 %v1657_v39, %v1582_v2 }
 0x6ce   : > { %1669 = vst.msk [vmem:[%s332_s11 + $0x8] sm:$0xff] %vm647_vm5, %v1667_v32 }
 0x6cf   : > { %1668 = vst.msk [vmem:[%s332_s11] sm:$0xff] %vm647_vm5, %v1666_v33 }
 0x6d0 PF: > { %s19_s30 = sadd.s32 1, %s2334_s30  }
 0x6d1   : > { %p16_p4 = scmp.ge.s32.totalorder %s19_s30, 4  }
 0x6d3   :  { %18 = sbr.rel (!%p16_p4) target bundleno = 1 (0x1), region = 90 }

</bundles_post_ra>
